<compile_context>
chip_gen: v6e
topology: v6e:2x2x1
jax: 0.10.0
libtpu: 0.0.40
codegen_flags: <defaults>
</compile_context>

<pallas_src>
import jax
import jax.numpy as jnp
from jax import lax
from jax.experimental import pallas as pl
from jax.experimental.pallas import tpu as pltpu


def _make_kernel(n_rows, tile_rows, fx, fu, inv_batch, u_scale):
    """Build the fused reduction kernel with compile-time constants baked in."""
    needs_mask = (n_rows % tile_rows) != 0

    def kernel(x_ref, y_ref, u_ref, mse_ref, reg_ref, acc_sq_ref, acc_u_ref):
        step = pl.program_id(0)

        @pl.when(step == 0)
        def _init():
            acc_sq_ref[...] = jnp.zeros_like(acc_sq_ref)
            acc_u_ref[...] = jnp.zeros_like(acc_u_ref)

        # Current tiles; arithmetic / accumulation in f32.
        d = (x_ref[...] - y_ref[...]).astype(jnp.float32)
        d2 = d * d
        u = u_ref[...].astype(jnp.float32)

        if needs_mask:
            # Mask the padded rows of the (possibly partial) last block.
            base = step * tile_rows

            def _valid(width):
                rows = lax.broadcasted_iota(jnp.int32, (tile_rows, width), 0) + base
                return rows < n_rows

            d2 = jnp.where(_valid(fx), d2, 0.0)
            u = jnp.where(_valid(fu), u, 0.0)

        # Per-tile partial sums reduced only along the row axis; accumulator stays
        # lane-shaped so the per-step work is plain VALU adds.
        acc_sq_ref[...] += jnp.sum(d2, axis=0, keepdims=True)
        acc_u_ref[...] += jnp.sum(u, axis=0, keepdims=True)

        @pl.when(step == pl.num_programs(0) - 1)
        def _finalize():
            # Single cross-lane reduce to scalar + normalization, once per call.
            mse_ref[0, 0] = jnp.sum(acc_sq_ref[...]) * inv_batch          # (X-Y)^2.mean(0).sum()
            reg_ref[0, 0] = jnp.sum(acc_u_ref[...]) * u_scale             # U.mean() * weight

    return kernel


def _choose_tile_rows(n_rows, bytes_per_row, target_bytes=3 << 20, max_rows=2048):
    """Pick a row tile so one grid step streams ~target_bytes of inputs.

    Big enough to amortize per-step overhead (>~0.5 MiB per input stream),
    small enough that 3 inputs x 2 pipeline buffers + f32 temporaries stay well
    under the v7x 64 MiB VMEM budget.
    """
    if n_rows <= 8:
        return n_rows
    t = target_bytes // max(1, bytes_per_row)
    t = max(8, min(t, max_rows, n_rows))
    return max(8, (t // 8) * 8)


def mse_loss(X, Y, U, weight: float = 1.0, tile_rows=None):
    assert X.ndim == 2 and X.shape == Y.shape, "X and Y must be 2D with identical shapes"
    # TODO(synk): U is assumed to share X's batch dimension (the usual call pattern
    # of this module); a U with an unrelated shape would need its own grid.
    assert U.ndim == 2 and U.shape[0] == X.shape[0], "U must share the batch dimension with X"

    n_rows, fx = X.shape
    fu = U.shape[1]

    bytes_per_row = 2 * fx * X.dtype.itemsize + fu * U.dtype.itemsize
    if tile_rows is None:
        tile_rows = _choose_tile_rows(n_rows, bytes_per_row)
    tile_rows = int(min(tile_rows, n_rows))
    num_blocks = pl.cdiv(n_rows, tile_rows)

    inv_batch = 1.0 / float(n_rows)                 # .mean(0).sum() == sum / batch
    u_scale = float(weight) / float(U.size)         # U.mean() * weight

    kernel = _make_kernel(n_rows, tile_rows, fx, fu, inv_batch, u_scale)

    total_in_bytes = (X.size * X.dtype.itemsize
                      + Y.size * Y.dtype.itemsize
                      + U.size * U.dtype.itemsize)
    cost = pl.CostEstimate(
        flops=3 * X.size + U.size,      # sub + mul + add per (X,Y) elem, add per U elem
        transcendentals=0,
        bytes_accessed=total_in_bytes + 8,
    )

    mse_out, reg_out = pl.pallas_call(
        kernel,
        out_shape=(
            jax.ShapeDtypeStruct((1, 1), jnp.float32),
            jax.ShapeDtypeStruct((1, 1), jnp.float32),
        ),
        grid=(num_blocks,),
        in_specs=[
            pl.BlockSpec((tile_rows, fx), lambda i: (i, 0)),
            pl.BlockSpec((tile_rows, fx), lambda i: (i, 0)),
            pl.BlockSpec((tile_rows, fu), lambda i: (i, 0)),
        ],
        out_specs=(
            pl.BlockSpec((1, 1), lambda i: (0, 0), memory_space=pltpu.SMEM),
            pl.BlockSpec((1, 1), lambda i: (0, 0), memory_space=pltpu.SMEM),
        ),
        scratch_shapes=[
            pltpu.VMEM((1, fx), jnp.float32),   # persistent partial-sum accumulator for (X-Y)^2
            pltpu.VMEM((1, fu), jnp.float32),   # persistent partial-sum accumulator for U
        ],
        compiler_params=pltpu.CompilerParams(
            dimension_semantics=("arbitrary",),          # accumulation axis
            vmem_limit_bytes=32 * 1024 * 1024,           # covers 3 x double-buffered tiles + temps
        ),
        cost_estimate=cost,
    )(X, Y, U)

    mse = mse_out[0, 0]
    regularization = reg_out[0, 0]

    # TODO(synk): MMDLossConstrained.diversity_loss(U) is not defined in the source
    # module; its contribution (diversity * weight * 10) is treated as 0.
    diversity = jnp.float32(0.0)

    return mse + diversity * jnp.float32(weight) * jnp.float32(10.0) + regularization


if __name__ == "__main__":
    key = jax.random.PRNGKey(0)
    kx, ky, ku = jax.random.split(key, 3)

    batch, hidden = 40, 128
    X = jax.random.normal(kx, (batch, hidden), dtype=jnp.float32)
    Y = jax.random.normal(ky, (batch, hidden), dtype=jnp.float32)
    U = jax.random.normal(ku, (batch, hidden), dtype=jnp.float32)

    weight = 0.5
    ref = jnp.sum(jnp.mean((X - Y) ** 2, axis=0)) + jnp.mean(U) * weight

    # Multi-step grid + partial last block (exercises accumulation and row masking).
    out_tiled = jax.block_until_ready(mse_loss(X, Y, U, weight=weight, tile_rows=16))
    assert jnp.allclose(out_tiled, ref, rtol=1e-5, atol=1e-5), (out_tiled, ref)

    # Auto tile choice (single block for this small shape).
    out_auto = jax.block_until_ready(mse_loss(X, Y, U, weight=weight))
    assert jnp.allclose(out_auto, ref, rtol=1e-5, atol=1e-5), (out_auto, ref)

    print("KERNEL_OK")
</pallas_src>

<mosaic_0001>
module attributes {stable_mosaic.version = 11 : i64} {
  func.func @kernel(%arg0: i32, %arg1: memref<16x128xf32, #tpu.memory_space<vmem>>, %arg2: memref<16x128xf32, #tpu.memory_space<vmem>>, %arg3: memref<16x128xf32, #tpu.memory_space<vmem>>, %arg4: memref<1x1xf32, #tpu.memory_space<smem>>, %arg5: memref<1x1xf32, #tpu.memory_space<smem>>, %arg6: memref<1x128xf32, #tpu.memory_space<vmem>>, %arg7: memref<1x128xf32, #tpu.memory_space<vmem>>) attributes {dimension_semantics = [#tpu.dimension_semantics<arbitrary>], iteration_bounds = array<i64: 3>, scalar_prefetch = 0 : i64, scratch_operands = 2 : i64, tpu.core_type = #tpu.core_type<tc>, window_params = [{transform_indices = @transform_0, window_bounds = array<i64: 16, 128>}, {transform_indices = @transform_1, window_bounds = array<i64: 16, 128>}, {transform_indices = @transform_2, window_bounds = array<i64: 16, 128>}, {transform_indices = @transform_3, window_bounds = array<i64: 1, 1>}, {transform_indices = @transform_4, window_bounds = array<i64: 1, 1>}]} {
    %c0_i32 = arith.constant 0 : i32
    %0 = arith.cmpi eq, %arg0, %c0_i32 : i32
    %1 = arith.extui %0 : i1 to i32
    %c0_i32_0 = arith.constant 0 : i32
    %2 = arith.cmpi ne, %1, %c0_i32_0 : i32
    scf.if %2 {
      %cst_19 = arith.constant 0.000000e+00 : f32
      %36 = vector.broadcast %cst_19 : f32 to vector<1x128xf32>
      %c0_20 = arith.constant 0 : index
      %c0_21 = arith.constant 0 : index
      %37 = vector.load %arg6[%c0_20, %c0_21] : memref<1x128xf32, #tpu.memory_space<vmem>>, vector<1x128xf32>
      tpu.vector_store %arg6[%c0_20, %c0_21], %36 {strides = array<i32>} : memref<1x128xf32, #tpu.memory_space<vmem>>, vector<1x128xf32>,
      %cst_22 = arith.constant 0.000000e+00 : f32
      %38 = vector.broadcast %cst_22 : f32 to vector<1x128xf32>
      %c0_23 = arith.constant 0 : index
      %c0_24 = arith.constant 0 : index
      %39 = vector.load %arg7[%c0_23, %c0_24] : memref<1x128xf32, #tpu.memory_space<vmem>>, vector<1x128xf32>
      tpu.vector_store %arg7[%c0_23, %c0_24], %38 {strides = array<i32>} : memref<1x128xf32, #tpu.memory_space<vmem>>, vector<1x128xf32>,
    } else {
    }
    %c0 = arith.constant 0 : index
    %c0_1 = arith.constant 0 : index
    %3 = vector.load %arg1[%c0, %c0_1] : memref<16x128xf32, #tpu.memory_space<vmem>>, vector<16x128xf32>
    %c0_2 = arith.constant 0 : index
    %c0_3 = arith.constant 0 : index
    %4 = vector.load %arg2[%c0_2, %c0_3] : memref<16x128xf32, #tpu.memory_space<vmem>>, vector<16x128xf32>
    %5 = arith.subf %3, %4 : vector<16x128xf32>
    %6 = arith.mulf %5, %5 : vector<16x128xf32>
    %c0_4 = arith.constant 0 : index
    %c0_5 = arith.constant 0 : index
    %7 = vector.load %arg3[%c0_4, %c0_5] : memref<16x128xf32, #tpu.memory_space<vmem>>, vector<16x128xf32>
    %c16_i32 = arith.constant 16 : i32
    %8 = arith.muli %arg0, %c16_i32 : i32
    %9 = tpu.iota {dimensions = array<i32: 0>} : vector<16x128xi32>
    %10 = vector.broadcast %8 : i32 to vector<16x128xi32>
    %11 = arith.addi %9, %10 : vector<16x128xi32>
    %c40_i32 = arith.constant 40 : i32
    %12 = vector.broadcast %c40_i32 : i32 to vector<16x128xi32>
    %13 = arith.cmpi slt, %11, %12 : vector<16x128xi32>
    %cst = arith.constant 0.000000e+00 : f32
    %14 = vector.broadcast %cst : f32 to vector<16x128xf32>
    %15 = arith.select %13, %6, %14 : vector<16x128xi1>, vector<16x128xf32>
    %16 = tpu.iota {dimensions = array<i32: 0>} : vector<16x128xi32>
    %17 = vector.broadcast %8 : i32 to vector<16x128xi32>
    %18 = arith.addi %16, %17 : vector<16x128xi32>
    %c40_i32_6 = arith.constant 40 : i32
    %19 = vector.broadcast %c40_i32_6 : i32 to vector<16x128xi32>
    %20 = arith.cmpi slt, %18, %19 : vector<16x128xi32>
    %cst_7 = arith.constant 0.000000e+00 : f32
    %21 = vector.broadcast %cst_7 : f32 to vector<16x128xf32>
    %22 = arith.select %20, %7, %21 : vector<16x128xi1>, vector<16x128xf32>
    %c0_8 = arith.constant 0 : index
    %c0_9 = arith.constant 0 : index
    %23 = vector.load %arg6[%c0_8, %c0_9] : memref<1x128xf32, #tpu.memory_space<vmem>>, vector<1x128xf32>
    %cst_10 = arith.constant dense<0.000000e+00> : vector<128xf32>
    %24 = vector.multi_reduction <add>, %15, %cst_10 [0] : vector<16x128xf32> to vector<128xf32>
    %25 = vector.shape_cast %24 : vector<128xf32> to vector<1x128xf32>
    %26 = arith.addf %23, %25 : vector<1x128xf32>
    %c0_11 = arith.constant 0 : index
    %c0_12 = arith.constant 0 : index
    %27 = vector.load %arg6[%c0_11, %c0_12] : memref<1x128xf32, #tpu.memory_space<vmem>>, vector<1x128xf32>
    tpu.vector_store %arg6[%c0_11, %c0_12], %26 {strides = array<i32>} : memref<1x128xf32, #tpu.memory_space<vmem>>, vector<1x128xf32>,
    %c0_13 = arith.constant 0 : index
    %c0_14 = arith.constant 0 : index
    %28 = vector.load %arg7[%c0_13, %c0_14] : memref<1x128xf32, #tpu.memory_space<vmem>>, vector<1x128xf32>
    %cst_15 = arith.constant dense<0.000000e+00> : vector<128xf32>
    %29 = vector.multi_reduction <add>, %22, %cst_15 [0] : vector<16x128xf32> to vector<128xf32>
    %30 = vector.shape_cast %29 : vector<128xf32> to vector<1x128xf32>
    %31 = arith.addf %28, %30 : vector<1x128xf32>
    %c0_16 = arith.constant 0 : index
    %c0_17 = arith.constant 0 : index
    %32 = vector.load %arg7[%c0_16, %c0_17] : memref<1x128xf32, #tpu.memory_space<vmem>>, vector<1x128xf32>
    tpu.vector_store %arg7[%c0_16, %c0_17], %31 {strides = array<i32>} : memref<1x128xf32, #tpu.memory_space<vmem>>, vector<1x128xf32>,
    %c2_i32 = arith.constant 2 : i32
    %33 = arith.cmpi eq, %arg0, %c2_i32 : i32
    %34 = arith.extui %33 : i1 to i32
    %c0_i32_18 = arith.constant 0 : i32
    %35 = arith.cmpi ne, %34, %c0_i32_18 : i32
    scf.if %35 {
      %c0_19 = arith.constant 0 : index
      %c0_20 = arith.constant 0 : index
      %36 = vector.load %arg6[%c0_19, %c0_20] : memref<1x128xf32, #tpu.memory_space<vmem>>, vector<1x128xf32>
      %37 = vector.shape_cast %36 : vector<1x128xf32> to vector<1x1x128xf32>
      %cst_21 = arith.constant dense<0.000000e+00> : vector<1xf32>
      %38 = vector.multi_reduction <add>, %37, %cst_21 [1, 2] : vector<1x1x128xf32> to vector<1xf32>
      %39 = vector.shape_cast %38 : vector<1xf32> to vector<1x1x1xf32>
      %40 = vector.extract %39[0, 0, 0] : f32 from vector<1x1x1xf32>
      %cst_22 = arith.constant 2.500000e-02 : f32
      %41 = arith.mulf %40, %cst_22 : f32
      %c0_23 = arith.constant 0 : index
      %c0_24 = arith.constant 0 : index
      %42 = memref.load %arg4[%c0_23, %c0_24] : memref<1x1xf32, #tpu.memory_space<smem>>
      memref.store %41, %arg4[%c0_23, %c0_24] : memref<1x1xf32, #tpu.memory_space<smem>>
      %c0_25 = arith.constant 0 : index
      %c0_26 = arith.constant 0 : index
      %43 = vector.load %arg7[%c0_25, %c0_26] : memref<1x128xf32, #tpu.memory_space<vmem>>, vector<1x128xf32>
      %44 = vector.shape_cast %43 : vector<1x128xf32> to vector<1x1x128xf32>
      %cst_27 = arith.constant dense<0.000000e+00> : vector<1xf32>
      %45 = vector.multi_reduction <add>, %44, %cst_27 [1, 2] : vector<1x1x128xf32> to vector<1xf32>
      %46 = vector.shape_cast %45 : vector<1xf32> to vector<1x1x1xf32>
      %47 = vector.extract %46[0, 0, 0] : f32 from vector<1x1x1xf32>
      %cst_28 = arith.constant 9.76562514E-5 : f32
      %48 = arith.mulf %47, %cst_28 : f32
      %c0_29 = arith.constant 0 : index
      %c0_30 = arith.constant 0 : index
      %49 = memref.load %arg5[%c0_29, %c0_30] : memref<1x1xf32, #tpu.memory_space<smem>>
      memref.store %48, %arg5[%c0_29, %c0_30] : memref<1x1xf32, #tpu.memory_space<smem>>
    } else {
    }
    return
  }
  func.func @transform_0(%arg0: i32) -> (i32, i32) {
    %c0_i32 = arith.constant 0 : i32
    %c0_i32_0 = arith.constant 0 : i32
    return %arg0, %c0_i32 : i32, i32
  }
  func.func @transform_1(%arg0: i32) -> (i32, i32) {
    %c0_i32 = arith.constant 0 : i32
    %c0_i32_0 = arith.constant 0 : i32
    return %arg0, %c0_i32 : i32, i32
  }
  func.func @transform_2(%arg0: i32) -> (i32, i32) {
    %c0_i32 = arith.constant 0 : i32
    %c0_i32_0 = arith.constant 0 : i32
    return %arg0, %c0_i32 : i32, i32
  }
  func.func @transform_3(%arg0: i32) -> (i32, i32) {
    %c0_i32 = arith.constant 0 : i32
    %c0_i32_0 = arith.constant 0 : i32
    %c0_i32_1 = arith.constant 0 : i32
    return %c0_i32, %c0_i32_0 : i32, i32
  }
  func.func @transform_4(%arg0: i32) -> (i32, i32) {
    %c0_i32 = arith.constant 0 : i32
    %c0_i32_0 = arith.constant 0 : i32
    %c0_i32_1 = arith.constant 0 : i32
    return %c0_i32, %c0_i32_0 : i32, i32
  }
}

</mosaic_0001>

<bundles_post_ra>
// kernel: tpu_custom_call.1
= control target key start
LH: loop header
LB: loop body
LE: loop exit
PB: predicated region body
PF: predicated region fallthrough
CT: control target
= control target key end

     0   :  { %10 = vsyncpa [#allocation5], 0  ;;  %s1012_s0 = inlined_call_operand.hbm [shape: f32[40,128], index: 0, kind: input, shape index: {}]   ;;  %s1013_s1 = inlined_call_operand.hbm [shape: f32[40,128], index: 1, kind: input, shape index: {}]   ;;  %s1014_s2 = inlined_call_operand.hbm [shape: f32[40,128], index: 2, kind: input, shape index: {}]   ;;  %s1015_s3 = inlined_call_operand.hbm [shape: f32[1,1], index: 3, kind: output, shape index: {0}]   ;;  %s1016_s4 = inlined_call_operand.hbm [shape: f32[1,1], index: 4, kind: output, shape index: {1}]  }
   0x1   :  { %12 = vsyncpa [#allocation5 + $0x1], 0 }
   0x2   :  { %13 = vsyncpa [#allocation8], 0 }
   0x3   :  { %15 = vsyncpa [#allocation8 + $0x1], 0 }
   0x4   :  { %16 = vsyncpa [#allocation6], 0 }
   0x5   :  { %17 = vsyncpa [#allocation12], 0  ;;  %s797_s15 = smov 0   ;;  %s799_s16 = smov 0  }
   0x6   :  { %s801_s17 = smov 0   ;;  %s803_s18 = smov 0  }
   0x7 LB: > { %s816_s19 = sadd.s32 4294967295, %s758_s18   ;;  %s819_s20 = sadd.s32 1, %s758_s18   ;;  %s758_s18 = sphi %s803_s18, %s1022_s18   ;;  %s754_s17 = sphi %s801_s17, %s1021_s17   ;;  %s750_s16 = sphi %s799_s16, %s1020_s16   ;;  %s746_s15 = sphi %s797_s15, %s1019_s15  }
   0x8   : > { %s27_s21 = ssub.s32 %s758_s18, %s819_s20  ;;  %s30_s22 = sadd.s32 1, %s754_s17 }
   0x9   : > { %p28_p0 = scmp.eq.s32.totalorder %s27_s21, 0  ;;  %p37_p1 = scmp.ne.s32.totalorder %s754_s17, %s750_s16 }
   0xa   : > { %p38_p2 = scmp.eq.s32.totalorder %s758_s18, 0  ;;  %p43_p3 = scmp.ne.s32.totalorder %s750_s16, %s746_s15 }
   0xb   : > { %s829_s23 = scalar_select %p28_p0, %s754_s17, %s30_s22  }
   0xc   : > { %p831_p4 = por %p38_p2, %p37_p1  ;;  %p44_p5 = scmp.eq.s32.totalorder %s816_s19, 0 }
   0xd   : > { %p516_p7 = scmp.ge.s32.totalorder %s758_s18, 3 }
   0xe   : > { %p836_p6 = por %p44_p5, %p43_p3 }
   0xf   : > { %157 = sbr.rel (%p516_p7) target bundleno = 116 (0x74), region = 16 }
  0x14   : > { %160 = sbr.rel (!%p831_p4) target bundleno = 52 (0x34), region = 20  ;;  %s161_s26 = sand.u32 (%p831_p4), 1, %s754_s17  }
  0x15   : > { %s518_s27 = sshll.u32 (%p831_p4), %s758_s18, 1  ;;  %s517_s28 = sshll.u32 (%p831_p4), %s161_s26, 4 }
  0x16   : > { %s167_s29 = ssub.s32 (%p831_p4), 5, %s518_s27  ;;  %s848_s6 = scalar_lea.sflag (%p831_p4), [#allocation5], %s161_s26 }
  0x17   : > { %p168_p8 = scmp.lt.s32.totalorder (%p831_p4), %s167_s29, 2  ;;  %s165_s7 = scalar_lea.vmem (%p831_p4), [#allocation4], %s517_s28 }
  0x19   : > { %s1024_s29 = smov (!%p168_p8, %s167_s29), 2 }
  0x1a   : > { %s845_s30 = sshll.u32 %s1024_s29, 7 }
  0x1b   : > { %s172_s5 = ssub.s32 256, %s845_s30 }
  0x1c   : > { %173 = vsyncadd %s848_s6, %s172_s5  ;;  %p520_p9 = scmp.ne.s32.totalorder %s845_s30, 0  ;;  %s551_s8 = sshll.u32 %s758_s18, 8 }
  0x1d   : > { %s856_s11 = scalar_lea.hbm %s1012_s0, %s551_s8  ;;  %s178_s12 = sshll.u32 %s165_s7, 4  ;;  %s858_s12 = int_to_ptr.vmem [resolvable:$true] %s178_s12 }
  0x1e   : > { %s614_s13 = scalar_lea.hbm %s856_s11, %s845_s30  ;;  %s618_s21 = scalar_lea.hbm %s1012_s0, 640 }
  0x1f   : > { %p615_p10 = scmp.ne.s32.totalorder %s856_s11, %s614_s13  ;;  %p619_p13 = scmp.lt.s32.totalorder %s856_s11, %s1012_s0 }
  0x20   : > { %p620_p0 = scmp.lt.s32.totalorder %s618_s21, %s614_s13 }
  0x21   : > { %p616_p11 = pnand %p615_p10, %p520_p9 }
  0x22   : > { %p621_p1 = por %p620_p0, %p619_p13 }
  0x23   : > { %p617_p12 = pneg %p616_p11 }
  0x25   : > { %p622_p2 = pnand %p621_p1, %p617_p12 }
  0x27   : > { %625 = shalt.err (!%p622_p2)
}
  0x28   : > { %s626_s27 = scalar_lea.vmem %s858_s12, %s845_s30  ;;  %s760_s28 = smov [#allocation4]  }
  0x29   : > { %p627_p3 = scmp.ne.s32.totalorder %s858_s12, %s626_s27  ;;  %s630_s29 = sshll.u32 %s760_s28, 4  ;;  %s631_s29 = int_to_ptr.vmem [resolvable:$false] %s630_s29 }
  0x2a   : > { %s632_s5 = scalar_lea.vmem %s631_s29, 512  ;;  %p633_p8 = scmp.lt.s32.totalorder %s858_s12, %s631_s29 }
  0x2b   : > { %p628_p5 = pnand %p627_p3, %p520_p9  ;;  %p634_p10 = scmp.lt.s32.totalorder %s632_s5, %s626_s27 }
  0x2d   : > { %p629_p7 = pneg %p628_p5  ;;  %p635_p11 = por %p634_p10, %p633_p8 }
  0x2f   : > { %p636_p13 = pnand %p635_p11, %p629_p7 }
  0x31   : > { %639 = shalt.err (!%p636_p13)
}
  0x32   : > { %s761_s7 = smov 128   ;;  %s762_s8 = smov 8  }
  0x33   : > { %184 = dma.hbm_to_vmem [thread:$0]  (%p520_p9), %s856_s11, %s845_s30, %s858_s12, %s848_s6, %s761_s7, %s761_s7, %s762_s8  }
  0x34 PF: > { %187 = sbr.rel (!%p831_p4) target bundleno = 84 (0x54), region = 24  ;;  %s188_s9 = sand.u32 (%p831_p4), 1, %s758_s18  }
  0x35   : > { %s190_s10 = sand.u32 (%p831_p4), 1, %s754_s17   ;;  %s525_s14 = sshll.u32 (%p831_p4), %s758_s18, 1 }
  0x36   : > { %s524_s13 = sshll.u32 (%p831_p4), %s190_s10, 4  ;;  %s194_s15 = ssub.s32 (%p831_p4), 5, %s525_s14 }
  0x37   : > { %p195_p12 = scmp.lt.s32.totalorder (%p831_p4), %s194_s15, 2  ;;  %s892_s26 = scalar_lea.sflag (%p831_p4), [#allocation8], %s188_s9 }
  0x38   : > { %s192_s30 = scalar_lea.vmem (%p831_p4), [#allocation7], %s524_s13 }
  0x39   : > { %s1026_s15 = smov (!%p195_p12, %s194_s15), 2 }
  0x3a   : > { %s889_s21 = sshll.u32 %s1026_s15, 7 }
  0x3b   : > { %s199_s22 = ssub.s32 256, %s889_s21 }
  0x3c   : > { %200 = vsyncadd %s892_s26, %s199_s22  ;;  %p527_p9 = scmp.ne.s32.totalorder %s889_s21, 0  ;;  %s552_s6 = sshll.u32 %s758_s18, 8 }
  0x3d   : > { %s900_s27 = scalar_lea.hbm %s1013_s1, %s552_s6  ;;  %s205_s28 = sshll.u32 %s192_s30, 4  ;;  %s902_s28 = int_to_ptr.vmem [resolvable:$true] %s205_s28 }
  0x3e   : > { %s640_s29 = scalar_lea.hbm %s900_s27, %s889_s21  ;;  %s644_s8 = scalar_lea.hbm %s1013_s1, 640 }
  0x3f   : > { %p641_p0 = scmp.ne.s32.totalorder %s900_s27, %s640_s29  ;;  %p645_p3 = scmp.lt.s32.totalorder %s900_s27, %s1013_s1 }
  0x40   : > { %p646_p5 = scmp.lt.s32.totalorder %s644_s8, %s640_s29 }
  0x41   : > { %p642_p1 = pnand %p641_p0, %p527_p9 }
  0x42   : > { %p647_p7 = por %p646_p5, %p645_p3 }
  0x43   : > { %p643_p2 = pneg %p642_p1 }
  0x45   : > { %p648_p8 = pnand %p647_p7, %p643_p2 }
  0x47   : > { %651 = shalt.err (!%p648_p8)
}
  0x48   : > { %s652_s13 = scalar_lea.vmem %s902_s28, %s889_s21  ;;  %s763_s14 = smov [#allocation7]  }
  0x49   : > { %p653_p10 = scmp.ne.s32.totalorder %s902_s28, %s652_s13  ;;  %s656_s15 = sshll.u32 %s763_s14, 4  ;;  %s657_s15 = int_to_ptr.vmem [resolvable:$false] %s656_s15 }
  0x4a   : > { %s658_s22 = scalar_lea.vmem %s657_s15, 512  ;;  %p659_p12 = scmp.lt.s32.totalorder %s902_s28, %s657_s15 }
  0x4b   : > { %p654_p11 = pnand %p653_p10, %p527_p9  ;;  %p660_p0 = scmp.lt.s32.totalorder %s658_s22, %s652_s13 }
  0x4d   : > { %p655_p13 = pneg %p654_p11  ;;  %p661_p1 = por %p660_p0, %p659_p12 }
  0x4f   : > { %p662_p3 = pnand %p661_p1, %p655_p13 }
  0x51   : > { %665 = shalt.err (!%p662_p3)
}
  0x52   : > { %s764_s30 = smov 128   ;;  %s765_s6 = smov 8  }
  0x53   : > { %211 = dma.hbm_to_vmem [thread:$0]  (%p527_p9), %s900_s27, %s889_s21, %s902_s28, %s892_s26, %s764_s30, %s764_s30, %s765_s6  }
  0x54 PF: > { %214 = sbr.rel (!%p831_p4) target bundleno = 116 (0x74), region = 28  ;;  %s215_s11 = sand.u32 (%p831_p4), 1, %s758_s18  }
  0x55   : > { %s217_s12 = sand.u32 (%p831_p4), 1, %s754_s17   ;;  %s532_s5 = sshll.u32 (%p831_p4), %s758_s18, 1 }
  0x56   : > { %s531_s29 = sshll.u32 (%p831_p4), %s217_s12, 4  ;;  %s221_s7 = ssub.s32 (%p831_p4), 5, %s532_s5 }
  0x57   : > { %p222_p2 = scmp.lt.s32.totalorder (%p831_p4), %s221_s7, 2  ;;  %s936_s10 = scalar_lea.sflag (%p831_p4), [#allocation8], %s215_s11 }
  0x58   : > { %s219_s21 = scalar_lea.vmem (%p831_p4), [#allocation9], %s531_s29 }
  0x59   : > { %s1028_s7 = smov (!%p222_p2, %s221_s7), 2 }
  0x5a   : > { %s933_s8 = sshll.u32 %s1028_s7, 7 }
  0x5b   : > { %s226_s9 = ssub.s32 256, %s933_s8 }
  0x5c   : > { %227 = vsyncadd %s936_s10, %s226_s9  ;;  %p534_p4 = scmp.ne.s32.totalorder %s933_s8, 0  ;;  %s553_s24 = sshll.u32 %s758_s18, 8 }
  0x5d   : > { %s944_s28 = scalar_lea.hbm %s1014_s2, %s553_s24  ;;  %s232_s13 = sshll.u32 %s219_s21, 4  ;;  %s946_s13 = int_to_ptr.vmem [resolvable:$true] %s232_s13 }
  0x5e   : > { %s666_s14 = scalar_lea.hbm %s944_s28, %s933_s8  ;;  %s670_s30 = scalar_lea.hbm %s1014_s2, 640 }
  0x5f   : > { %p667_p9 = scmp.ne.s32.totalorder %s944_s28, %s666_s14  ;;  %p671_p8 = scmp.lt.s32.totalorder %s944_s28, %s1014_s2 }
  0x60   : > { %p672_p10 = scmp.lt.s32.totalorder %s670_s30, %s666_s14 }
  0x61   : > { %p668_p5 = pnand %p667_p9, %p534_p4 }
  0x62   : > { %p673_p11 = por %p672_p10, %p671_p8 }
  0x63   : > { %p669_p7 = pneg %p668_p5 }
  0x65   : > { %p674_p13 = pnand %p673_p11, %p669_p7 }
  0x67   : > { %677 = shalt.err (!%p674_p13)
}
  0x68   : > { %s678_s12 = scalar_lea.vmem %s946_s13, %s933_s8  ;;  %s766_s29 = smov [#allocation9]  }
  0x69   : > { %p679_p12 = scmp.ne.s32.totalorder %s946_s13, %s678_s12  ;;  %s682_s5 = sshll.u32 %s766_s29, 4  ;;  %s683_s5 = int_to_ptr.vmem [resolvable:$false] %s682_s5 }
  0x6a   : > { %s684_s7 = scalar_lea.vmem %s683_s5, 512  ;;  %p685_p3 = scmp.lt.s32.totalorder %s946_s13, %s683_s5 }
  0x6b   : > { %p680_p0 = pnand %p679_p12, %p534_p4  ;;  %p686_p2 = scmp.lt.s32.totalorder %s684_s7, %s678_s12 }
  0x6d   : > { %p681_p1 = pneg %p680_p0  ;;  %p687_p9 = por %p686_p2, %p685_p3 }
  0x6f   : > { %p688_p5 = pnand %p687_p9, %p681_p1 }
  0x71   : > { %691 = shalt.err (!%p688_p5)
}
  0x72   : > { %s767_s9 = smov 128   ;;  %s768_s21 = smov 8  }
  0x73   : > { %238 = dma.hbm_to_vmem [thread:$0]  (%p534_p4), %s944_s28, %s933_s8, %s946_s13, %s936_s10, %s767_s9, %s767_s9, %s768_s21  }
  0x74 PF: > { %p538_p7 = scmp.ge.s32.totalorder %s758_s18, 1  ;;  %p240_p8 = scmp.lt.s32.totalorder %s758_s18, 4 }
  0x76   : > { %p241_p10 = pnand %p538_p7, %p240_p8 }
  0x77   : > { %s246_s24 = sand.u32 (!%p241_p10), 1, %s750_s16  }
  0x78   : > { %244 = sbr.rel (%p241_p10) target bundleno = 389 (0x185), region = 32  ;;  %s975_s26 = sshll.u32 (!%p241_p10), %s246_s24, 4 }
  0x79   : > { %s247_s27 = scalar_lea.sflag (!%p241_p10), [#allocation5], %s246_s24  ;;  %s250_s14 = scalar_lea.vmem (!%p241_p10), [#allocation4], %s975_s26 }
  0x7d   : > { %729 = dma.done.wait (%p836_p6), %s247_s27, 256  }
  0x7e   : > { %731 = vsyncadd (%p836_p6), %s247_s27, 4294967040  ;;  %s255_s8 = sand.u32 1, %s816_s19   ;;  %s259_s10 = scalar_lea.vmem [#allocation7], %s975_s26 }
  0x7f   : > { %s256_s18 = scalar_lea.sflag [#allocation8], %s255_s8 }
  0x80   : > { %733 = dma.done.wait (%p836_p6), %s256_s18, 512  }
  0x81   : > { %735 = vsyncadd (%p836_p6), %s256_s18, 4294966784  ;;  %s268_s28 = scalar_lea.vmem [#allocation9], %s975_s26  ;;  %p542_p4 = scmp.ne.s32.totalorder %s816_s19, 0 }
  0x83   : > { %316 = sbr.rel (%p542_p4) target bundleno = 138 (0x8a), region = 48 }
  0x88   : > { %v769_v0 = vmov 0.0  }
  0x89   : > { %317 = vst [vmem:[#allocation2] sm:$0x1] %v769_v0  ;;  %318 = vst [vmem:[#allocation3] sm:$0x1] %v769_v0 }
  0x8a PF: > { %v319_v1 = vld [vmem:[%s250_s14] sm:$0xff]  ;;  %v320_v2 = vld [vmem:[%s250_s14 + $0x8] sm:$0xff]  ;;  %s543_s13 = sshll.u32 %s816_s19, 4  ;;  %v330_v4 = vlaneseq  ;;  %p544_p6 = scmp.ne.s32.totalorder %s816_s19, 2 }
  0x8b   : > { %v321_v3 = vld [vmem:[%s259_s10] sm:$0xff]  ;;  %v322_v5 = vld [vmem:[%s259_s10 + $0x8] sm:$0xff]  ;;  %v333_v7 = vstv %s543_s13 }
  0x8c   : > { %v323_v6 = vsub.f32 %v319_v1, %v321_v3  ;;  %v324_v8 = vsub.f32 %v320_v2, %v322_v5  ;;  %v331_v9 = vshrl.u32 %v330_v4, 7  ;;  %v327_v13 = vld [vmem:[%s268_s28] sm:$0xff]  ;;  %v328_v16 = vld [vmem:[%s268_s28 + $0x8] sm:$0xff] }
  0x8e   : > { %v325_v10 = vmul.f32 %v323_v6, %v323_v6  ;;  %v332_v11 = vadd.s32 8, %v331_v9  ;;  %v334_v12 = vadd.s32 %v333_v7, %v331_v9  ;;  %v326_v14 = vmul.f32 %v324_v8, %v324_v8 }
  0x90   : > { %v335_v15 = vadd.s32 %v333_v7, %v332_v11  ;;  %vm336_vm0 = vcmp.lt.s32.totalorder %v334_v12, 40  ;;  %v342_v33 = vld [vmem:[#allocation2] sm:$0x1]  ;;  %v352_v34 = vld [vmem:[#allocation3] sm:$0x1] }
  0x91   : > { %v338_v17 = vsel %vm336_vm0, %v325_v10, 0.0  ;;  %v340_v18 = vsel %vm336_vm0, %v327_v13, 0.0 }
  0x92   : > { %vm337_vm1 = vcmp.lt.s32.totalorder %v335_v15, 40 }
  0x93   : > { %v339_v19 = vsel %vm337_vm1, %v326_v14, 0.0  ;;  %v341_v20 = vsel %vm337_vm1, %v328_v16, 0.0 }
  0x94   : > { %v343_v21 = vadd.f32 %v339_v19, %v338_v17  ;;  %v353_v22 = vadd.f32 %v341_v20, %v340_v18 }
  0x96   : > { %v344_v23 = vrot.slane %v343_v21, 4  ;;  %v354_v24 = vrot.slane %v353_v22, 4 }
  0x98   : > { %v345_v25 = vadd.f32 %v344_v23, %v343_v21  ;;  %v355_v26 = vadd.f32 %v354_v24, %v353_v22 }
  0x9a   : > { %v346_v27 = vrot.slane %v345_v25, 2  ;;  %v356_v28 = vrot.slane %v355_v26, 2 }
  0x9c   : > { %v347_v29 = vadd.f32 %v346_v27, %v345_v25  ;;  %v357_v30 = vadd.f32 %v356_v28, %v355_v26 }
  0x9e   : > { %v348_v31 = vrot.slane %v347_v29, 1  ;;  %v358_v32 = vrot.slane %v357_v30, 1 }
  0xa0   : > { %v349_v35 = vadd.f32 %v348_v31, %v347_v29  ;;  %v359_v36 = vadd.f32 %v358_v32, %v357_v30  ;;  %365 = sbr.rel (%p544_p6) target bundleno = 380 (0x17c), region = 52 }
  0xa2   : > { %v350_v37 = vadd.f32 %v349_v35, %v342_v33  ;;  %v360_v38 = vadd.f32 %v359_v36, %v352_v34 }
  0xa4   : > { %351 = vst [vmem:[#allocation2] sm:$0x1] %v350_v37  ;;  %361 = vst [vmem:[#allocation3] sm:$0x1] %v360_v38 }
  0xa5   : > { %vm367_vm2 = vcmask 1040384  }
  0xab   : > { %v366_v39 = vld [vmem:[#allocation2] sm:$0x1]  ;;  %v381_v40 = vld [vmem:[#allocation3] sm:$0x1] }
  0xac   : > { %v368_v41 = vsel %vm367_vm2, %v366_v39, 0.0  ;;  %v382_v42 = vsel %vm367_vm2, %v381_v40, 0.0 }
  0xad   : > { %369 = vadd.xlane.f32.xlu0 %v368_v41 }
  0xb1   : > { %383 = vadd.xlane.f32.xlu0 %v382_v42 }
 0x136   : > { %v370_v43 = vpop.xlane.xlu0 %369 }
 0x137   : > { %v371_v44 = vrot.slane %v370_v43, 4 }
 0x139   : > { %v372_v45 = vadd.f32 %v371_v44, %v370_v43 }
 0x13a   : > { %v384_v46 = vpop.xlane.xlu0 %383 }
 0x13b   : > { %v373_v47 = vrot.slane %v372_v45, 2  ;;  %v385_v48 = vrot.slane %v384_v46, 4 }
 0x13d   : > { %v386_v49 = vadd.f32 %v385_v48, %v384_v46  ;;  %v374_v50 = vadd.f32 %v373_v47, %v372_v45 }
 0x13f   : > { %v387_v51 = vrot.slane %v386_v49, 2  ;;  %v375_v52 = vrot.slane %v374_v50, 1 }
 0x141   : > { %v388_v53 = vadd.f32 %v387_v51, %v386_v49  ;;  %v376_v54 = vadd.f32 %v375_v52, %v374_v50 }
 0x143   : > { %554 = vpush %v376_v54  ;;  %v389_v55 = vrot.slane %v388_v53, 1 }
 0x145   : > { %v390_v56 = vadd.f32 %v389_v55, %v388_v53 }
 0x147   : > { %556 = vpush %v390_v56 }
 0x174   : > { %s555_s25 = spop %554 }
 0x175   : > { %s378_s15 = smul.f32 0.025, %s555_s25 }
 0x177   : > { %380 = sst [smem:[#allocation10]] %s378_s15 }
 0x178   : > { %s557_s22 = spop %556 }
 0x179   : > { %s392_s30 = smul.f32 9.765625e-05, %s557_s22 }
 0x17b   : > { %394 = sst [smem:[#allocation11]] %s392_s30 }
 0x17c PF: > { %p569_p11 = scmp.eq.s32.totalorder %s816_s19, 2  ;;  %s770_s6 = smov [#allocation10]  }
 0x17d   : > { %s771_s29 = smov [#allocation11]  }
 0x17e   : > { %562 = dma.smem_to_hbm (%p569_p11), %s770_s6, 16, %s1015_s3, [#allocation6]  }
 0x17f   : > { %564 = dma.smem_to_hbm (%p569_p11), %s771_s29, 16, %s1016_s4, [#allocation12]  }
 0x180   : > { %737 = dma.done.wait (%p569_p11), [#allocation6], 16  }
 0x181   : > { %739 = vsyncadd (%p569_p11), [#allocation6], 4294967280 }
 0x182   : > { %741 = dma.done.wait (%p569_p11), [#allocation12], 16  }
 0x183   : > { %743 = vsyncadd (%p569_p11), [#allocation12], 4294967280 }
 0x184   : > { %421 = sfence }
 0x185 PF: > { %p20_p13 = scmp.ge.s32.totalorder %s819_s20, 5   ;;  %s1019_s15 = smov %s750_s16 }
 0x186   : > { %s1020_s16 = smov %s754_s17  ;;  %s1021_s17 = smov %s829_s23 }
 0x187   : > { %s1022_s18 = smov %s819_s20  ;;  %22 = sbr.rel (!%p20_p13) target bundleno = 7 (0x7), region = 111 }
 0x18c   :  { %427 = vsyncpa [#allocation5], 1 }
 0x18d   :  { %429 = vsyncpa [#allocation5 + $0x1], 1 }
 0x18e   :  { %430 = vsyncpa [#allocation8], 1 }
 0x18f   :  { %432 = vsyncpa [#allocation8 + $0x1], 1 }
 0x190   :  { %433 = vsyncpa [#allocation6], 1 }
 0x191   :  { %435 = vsyncpa [#allocation6 + $0x1], 1 }
 0x192   :  { %436 = vsyncpa [#allocation12], 1 }

</bundles_post_ra>
